<compile_context>
chip_gen: v7x
topology: tpu7x:2x2x1
jax: 0.10.0
libtpu: 0.0.40
codegen_flags: <defaults>
</compile_context>

<pallas_src>
import math

import jax
import jax.numpy as jnp
from jax.experimental import pallas as pl
from jax.experimental.pallas import tpu as pltpu


def _round_up(a: int, m: int) -> int:
    return ((a + m - 1) // m) * m


def _sinusoidal_pe(offset: int, size: int, d_model: int, dtype=jnp.float32):
    """Standard WeNet sinusoidal positional encoding, shape (size, d_model)."""
    pos = jnp.arange(offset, offset + size, dtype=jnp.float32)[:, None]      # (T, 1)
    div = jnp.exp(
        jnp.arange(0, d_model, 2, dtype=jnp.float32)
        * -(math.log(10000.0) / d_model)
    )                                                                         # (ceil(d/2),)
    angles = pos * div[None, :]                                               # (T, ceil(d/2))
    pe = jnp.zeros((size, d_model), dtype=jnp.float32)
    pe = pe.at[:, 0::2].set(jnp.sin(angles))
    pe = pe.at[:, 1::2].set(jnp.cos(angles[:, : d_model // 2]))               # odd d_model safe
    return pe.astype(dtype)


def _make_kernel(eps: float, odim: int):
    inv_odim = 1.0 / float(odim)

    def kernel(x_ref, w_ref, p_ref, pe_ref, o_ref):
        # x_ref : (tT, idim)       f32  (batch dim squeezed out)
        # w_ref : (idim, odim_pad) f32  (VMEM resident; pad columns are zero)
        # p_ref : (3, odim_pad)    f32  rows: bias, gamma*sqrt(odim), beta*sqrt(odim)
        # pe_ref: (tT, odim_pad)   bf16 raw sinusoidal PE
        # o_ref : (tT, odim_pad)
        bias = p_ref[0:1, :]
        gamma_s = p_ref[1:2, :]
        beta_s = p_ref[2:3, :]

        # Linear: bf16 MXU matmul with f32 accumulation (pad columns stay exactly 0).
        y = jnp.dot(
            x_ref[...].astype(jnp.bfloat16),
            w_ref[...].astype(jnp.bfloat16),
            preferred_element_type=jnp.float32,
        ) + bias

        # LayerNorm, one-pass statistics normalised by the *true* odim
        # (zero pad columns contribute 0 to both sums).
        mean = jnp.sum(y, axis=-1, keepdims=True) * inv_odim
        ex2 = jnp.sum(y * y, axis=-1, keepdims=True) * inv_odim
        var = jnp.maximum(ex2 - mean * mean, 0.0)
        yn = (y - mean) * jax.lax.rsqrt(var + eps)

        # TODO(synk): Dropout omitted (eval mode / identity).

        # Fused affine * xscale + positional encoding:
        #   yn * (gamma*xscale) + (beta*xscale + pe)
        o_ref[...] = (
            yn * gamma_s + (beta_s + pe_ref[...].astype(jnp.float32))
        ).astype(o_ref.dtype)

    return kernel


def _choose_time_tile(T, idim, odim_pad, requested, budget_bytes=24 * 1024 * 1024):
    """Largest multiple-of-8 time tile whose double-buffered footprint fits VMEM."""
    tT = min(_round_up(T, 8), _round_up(requested, 8))

    def footprint(t):
        x_blk = t * idim * 4
        out_blk = t * odim_pad * 4
        pe_blk = t * odim_pad * 2
        w_blk = idim * odim_pad * 4
        p_blk = 3 * odim_pad * 4
        interm = 3 * t * odim_pad * 4          # f32 temporaries (y / yn / ...)
        return 2 * (x_blk + out_blk + pe_blk + w_blk + p_blk) + interm

    while tT > 8 and footprint(tT) > budget_bytes:
        tT = max(8, _round_up(tT // 2, 8))
    return tT


def linear_no_subsampling(x, x_mask, weight, bias, ln_gamma, ln_beta,
                          offset: int = 0, time_tile: int = 1024, out_dtype=None):
    """Pallas implementation of LinearNoSubsampling.forward (eval mode).

    Args:
      x:        (B, T, idim) float32
      x_mask:   (B, 1, T) bool
      weight:   (idim, odim) float32   (== torch Linear weight transposed)
      bias:     (odim,) float32
      ln_gamma: (odim,) float32
      ln_beta:  (odim,) float32
    Returns:
      (x_out (B, T, odim), pos_emb (1, T, odim), x_mask)
    """
    B, T, idim = x.shape
    odim = weight.shape[1]
    eps = 1e-5
    xscale = math.sqrt(odim)
    out_dtype = x.dtype if out_dtype is None else out_dtype

    odim_pad = _round_up(odim, 128)
    tT = _choose_time_tile(T, idim, odim_pad, time_tile)
    nT = pl.cdiv(T, tT)

    # --- small host-side param prep (O(idim*odim) + O(T*odim), tiny vs x/out) ---
    w_in = weight.astype(jnp.float32)
    params = jnp.stack([
        bias.astype(jnp.float32),
        ln_gamma.astype(jnp.float32) * xscale,
        ln_beta.astype(jnp.float32) * xscale,
    ])                                                                  # (3, odim)
    if odim_pad != odim:
        w_in = jnp.pad(w_in, ((0, 0), (0, odim_pad - odim)))
        params = jnp.pad(params, ((0, 0), (0, odim_pad - odim)))

    # TODO(synk): cache the PE table across calls (depends only on offset/T/odim).
    pe_raw = _sinusoidal_pe(offset, T, odim, dtype=jnp.float32)          # (T, odim)
    pe_kern = pe_raw
    if odim_pad != odim:
        pe_kern = jnp.pad(pe_kern, ((0, 0), (0, odim_pad - odim)))
    pe_kern = pe_kern.astype(jnp.bfloat16)                               # (T, odim_pad)

    # batch innermost -> PE / weight / params tiles are NOT re-DMA'd per batch.
    grid = (nT, B)

    out = pl.pallas_call(
        _make_kernel(eps, odim),
        out_shape=jax.ShapeDtypeStruct((B, T, odim_pad), out_dtype),
        grid_spec=pltpu.PrefetchScalarGridSpec(
            num_scalar_prefetch=0,
            grid=grid,
            in_specs=[
                # x: squeeze batch dim -> kernel sees (tT, idim); full-dim idim block
                pl.BlockSpec((None, tT, idim), lambda t, b: (b, t, 0)),
                # weight / params: constant index map -> fetched once, VMEM-resident
                pl.BlockSpec((idim, odim_pad), lambda t, b: (0, 0)),
                pl.BlockSpec((3, odim_pad), lambda t, b: (0, 0)),
                # PE: block index constant across the inner (batch) axis
                pl.BlockSpec((tT, odim_pad), lambda t, b: (t, 0)),
            ],
            out_specs=pl.BlockSpec((None, tT, odim_pad), lambda t, b: (b, t, 0)),
        ),
        compiler_params=pltpu.CompilerParams(
            dimension_semantics=("parallel", "parallel"),
            vmem_limit_bytes=32 * 1024 * 1024,
        ),
    )(x, w_in, params, pe_kern)

    if odim_pad != odim:
        out = out[..., :odim]

    pos_emb = pe_raw[None, :, :]   # (1, T, odim) raw f32 PE, WeNet convention
    return out, pos_emb, x_mask


if __name__ == "__main__":
    # Small, deterministic example shapes.
    B, T, idim, odim = 2, 8, 32, 32

    key = jax.random.PRNGKey(0)
    kx, kw, kb, kg, kbt = jax.random.split(key, 5)

    x = jax.random.normal(kx, (B, T, idim), dtype=jnp.float32)
    x_mask = jnp.ones((B, 1, T), dtype=jnp.bool_)

    # Deterministic parameter init (synthetic, not a checkpoint).
    weight = jax.random.normal(kw, (idim, odim), dtype=jnp.float32) / math.sqrt(idim)
    bias = jax.random.normal(kb, (odim,), dtype=jnp.float32) * 0.01
    ln_gamma = 1.0 + 0.1 * jax.random.normal(kg, (odim,), dtype=jnp.float32)
    ln_beta = 0.05 * jax.random.normal(kbt, (odim,), dtype=jnp.float32)

    y, pos_emb, mask_out = linear_no_subsampling(
        x, x_mask, weight, bias, ln_gamma, ln_beta, offset=0
    )
    jax.block_until_ready((y, pos_emb, mask_out))

    # Correctness check vs. pure-JAX reference mirroring the kernel's
    # bf16-matmul / f32-everything-else numerics.
    lin = jnp.dot(x.astype(jnp.bfloat16), weight.astype(jnp.bfloat16),
                  preferred_element_type=jnp.float32) + bias
    mu = lin.mean(-1, keepdims=True)
    var = ((lin - mu) ** 2).mean(-1, keepdims=True)
    ref = (lin - mu) / jnp.sqrt(var + 1e-5) * ln_gamma + ln_beta
    ref = ref * math.sqrt(odim) + _sinusoidal_pe(0, T, odim)[None]

    assert y.shape == (B, T, odim)
    assert pos_emb.shape == (1, T, odim)
    assert mask_out.shape == (B, 1, T)
    assert jnp.allclose(pos_emb[0], _sinusoidal_pe(0, T, odim), atol=1e-6)
    assert jnp.allclose(y, ref, atol=1e-2, rtol=1e-2), (
        float(jnp.max(jnp.abs(y - ref)))
    )

    print("KERNEL_OK")
</pallas_src>

<mosaic_0001>
module attributes {stable_mosaic.version = 11 : i64} {
  func.func @kernel(%arg0: i32, %arg1: i32, %arg2: memref<1x8x32xf32, #tpu.memory_space<vmem>>, %arg3: memref<32x128xf32, #tpu.memory_space<vmem>>, %arg4: memref<3x128xf32, #tpu.memory_space<vmem>>, %arg5: memref<8x128xbf16, #tpu.memory_space<vmem>>, %arg6: memref<1x8x128xf32, #tpu.memory_space<vmem>>) attributes {dimension_semantics = [#tpu.dimension_semantics<parallel>, #tpu.dimension_semantics<parallel>], iteration_bounds = array<i64: 1, 2>, scalar_prefetch = 0 : i64, scratch_operands = 0 : i64, tpu.core_type = #tpu.core_type<tc>, window_params = [{transform_indices = @transform_0, window_bounds = array<i64: 1, 8, 32>}, {pipeline_mode = #tpu.pipeline_mode<synchronous>, transform_indices = @transform_1, window_bounds = array<i64: 32, 128>}, {pipeline_mode = #tpu.pipeline_mode<synchronous>, transform_indices = @transform_2, window_bounds = array<i64: 3, 128>}, {transform_indices = @transform_3, window_bounds = array<i64: 8, 128>}, {transform_indices = @transform_4, window_bounds = array<i64: 1, 8, 128>}]} {
    %c0 = arith.constant 0 : index
    %c0_0 = arith.constant 0 : index
    %0 = vector.load %arg4[%c0, %c0_0] : memref<3x128xf32, #tpu.memory_space<vmem>>, vector<1x128xf32>
    %c1 = arith.constant 1 : index
    %c0_1 = arith.constant 0 : index
    %1 = vector.load %arg4[%c1, %c0_1] : memref<3x128xf32, #tpu.memory_space<vmem>>, vector<1x128xf32>
    %c2 = arith.constant 2 : index
    %c0_2 = arith.constant 0 : index
    %2 = vector.load %arg4[%c2, %c0_2] : memref<3x128xf32, #tpu.memory_space<vmem>>, vector<1x128xf32>
    %c0_3 = arith.constant 0 : index
    %c0_4 = arith.constant 0 : index
    %c0_5 = arith.constant 0 : index
    %3 = vector.load %arg2[%c0_3, %c0_4, %c0_5] : memref<1x8x32xf32, #tpu.memory_space<vmem>>, vector<1x8x32xf32>
    %4 = vector.shape_cast %3 : vector<1x8x32xf32> to vector<8x32xf32>
    %5 = arith.truncf %4 : vector<8x32xf32> to vector<8x32xbf16>
    %c0_6 = arith.constant 0 : index
    %c0_7 = arith.constant 0 : index
    %6 = vector.load %arg3[%c0_6, %c0_7] : memref<32x128xf32, #tpu.memory_space<vmem>>, vector<32x128xf32>
    %7 = arith.truncf %6 : vector<32x128xf32> to vector<32x128xbf16>
    %cst = arith.constant dense<0.000000e+00> : vector<8x128xf32>
    %8 = tpu.matmul %5, %7, %cst {dimension_numbers = #tpu.dot_dimension_numbers<[1], [0], [0], [1], [0, 0, 1, 1], [], []>} : vector<8x32xbf16>, vector<32x128xbf16>, vector<8x128xf32> -> vector<8x128xf32>
    %9 = vector.broadcast %0 : vector<1x128xf32> to vector<8x128xf32>
    %10 = arith.addf %8, %9 : vector<8x128xf32>
    %cst_8 = arith.constant dense<0.000000e+00> : vector<8xf32>
    %11 = vector.multi_reduction <add>, %10, %cst_8 [1] : vector<8x128xf32> to vector<8xf32>
    %12 = vector.shape_cast %11 : vector<8xf32> to vector<8x1xf32>
    %cst_9 = arith.constant 3.125000e-02 : f32
    %13 = vector.broadcast %cst_9 : f32 to vector<8x1xf32>
    %14 = arith.mulf %12, %13 : vector<8x1xf32>
    %15 = arith.mulf %10, %10 : vector<8x128xf32>
    %cst_10 = arith.constant dense<0.000000e+00> : vector<8xf32>
    %16 = vector.multi_reduction <add>, %15, %cst_10 [1] : vector<8x128xf32> to vector<8xf32>
    %17 = vector.shape_cast %16 : vector<8xf32> to vector<8x1xf32>
    %cst_11 = arith.constant 3.125000e-02 : f32
    %18 = vector.broadcast %cst_11 : f32 to vector<8x1xf32>
    %19 = arith.mulf %17, %18 : vector<8x1xf32>
    %20 = arith.mulf %14, %14 : vector<8x1xf32>
    %21 = arith.subf %19, %20 : vector<8x1xf32>
    %cst_12 = arith.constant 0.000000e+00 : f32
    %22 = vector.broadcast %cst_12 : f32 to vector<8x1xf32>
    %23 = arith.maximumf %21, %22 : vector<8x1xf32>
    %24 = vector.broadcast %14 : vector<8x1xf32> to vector<8x128xf32>
    %25 = arith.subf %10, %24 : vector<8x128xf32>
    %cst_13 = arith.constant 9.99999974E-6 : f32
    %26 = vector.broadcast %cst_13 : f32 to vector<8x1xf32>
    %27 = arith.addf %23, %26 : vector<8x1xf32>
    %28 = math.rsqrt %27 : vector<8x1xf32>
    %29 = vector.broadcast %28 : vector<8x1xf32> to vector<8x128xf32>
    %30 = arith.mulf %25, %29 : vector<8x128xf32>
    %31 = vector.broadcast %1 : vector<1x128xf32> to vector<8x128xf32>
    %32 = arith.mulf %30, %31 : vector<8x128xf32>
    %c0_14 = arith.constant 0 : index
    %c0_15 = arith.constant 0 : index
    %33 = vector.load %arg5[%c0_14, %c0_15] : memref<8x128xbf16, #tpu.memory_space<vmem>>, vector<8x128xbf16>
    %34 = arith.extf %33 : vector<8x128xbf16> to vector<8x128xf32>
    %35 = vector.broadcast %2 : vector<1x128xf32> to vector<8x128xf32>
    %36 = arith.addf %35, %34 : vector<8x128xf32>
    %37 = arith.addf %32, %36 : vector<8x128xf32>
    %c0_16 = arith.constant 0 : index
    %c0_17 = arith.constant 0 : index
    %c0_18 = arith.constant 0 : index
    %38 = vector.load %arg6[%c0_16, %c0_17, %c0_18] : memref<1x8x128xf32, #tpu.memory_space<vmem>>, vector<1x8x128xf32>
    %39 = vector.shape_cast %38 : vector<1x8x128xf32> to vector<8x128xf32>
    %40 = vector.shape_cast %37 : vector<8x128xf32> to vector<1x8x128xf32>
    tpu.vector_store %arg6[%c0_16, %c0_17, %c0_18], %40 {strides = array<i32>} : memref<1x8x128xf32, #tpu.memory_space<vmem>>, vector<1x8x128xf32>,
    return
  }
  func.func @transform_0(%arg0: i32, %arg1: i32) -> (i32, i32, i32) {
    %c0_i32 = arith.constant 0 : i32
    %c0_i32_0 = arith.constant 0 : i32
    return %arg1, %arg0, %c0_i32 : i32, i32, i32
  }
  func.func @transform_1(%arg0: i32, %arg1: i32) -> (i32, i32) {
    %c0_i32 = arith.constant 0 : i32
    %c0_i32_0 = arith.constant 0 : i32
    %c0_i32_1 = arith.constant 0 : i32
    return %c0_i32, %c0_i32_0 : i32, i32
  }
  func.func @transform_2(%arg0: i32, %arg1: i32) -> (i32, i32) {
    %c0_i32 = arith.constant 0 : i32
    %c0_i32_0 = arith.constant 0 : i32
    %c0_i32_1 = arith.constant 0 : i32
    return %c0_i32, %c0_i32_0 : i32, i32
  }
  func.func @transform_3(%arg0: i32, %arg1: i32) -> (i32, i32) {
    %c0_i32 = arith.constant 0 : i32
    %c0_i32_0 = arith.constant 0 : i32
    return %arg0, %c0_i32 : i32, i32
  }
  func.func @transform_4(%arg0: i32, %arg1: i32) -> (i32, i32, i32) {
    %c0_i32 = arith.constant 0 : i32
    %c0_i32_0 = arith.constant 0 : i32
    return %arg1, %arg0, %c0_i32 : i32, i32, i32
  }
}

</mosaic_0001>

<bundles_post_ra>
// kernel: tpu_custom_call.1
= control target key start
LH: loop header
LB: loop body
LE: loop exit
PB: predicated region body
PF: predicated region fallthrough
CT: control target
= control target key end

     0   :  { %9 = vsyncpa [#allocation3], 0  ;;  %s988_s0 = inlined_call_operand.hbm [shape: f32[2,8,32], index: 0, kind: input, shape index: {}]   ;;  %s989_s1 = inlined_call_operand.hbm [shape: f32[32,128], index: 1, kind: input, shape index: {}]   ;;  %s990_s2 = inlined_call_operand.vmem [shape: f32[3,128], index: 2, kind: input, shape index: {}]   ;;  %s991_s3 = inlined_call_operand.vmem [shape: bf16[8,128], index: 3, kind: input, shape index: {}]   ;;  %s992_s4 = inlined_call_operand.hbm [shape: f32[2,8,128], index: 4, kind: output, shape index: {}]  }
   0x1   :  { %11 = vsyncpa [#allocation3 + $0x1], 0 }
   0x2   :  { %12 = vsyncpa [#allocation6], 0 }
   0x3   :  { %13 = vsyncpa [#allocation4], 0 }
   0x4   :  { %15 = vsyncpa [#allocation4 + $0x1], 0  ;;  %s758_s15 = smov 0   ;;  %s760_s16 = smov 0  }
   0x5   :  { %s762_s17 = smov 0   ;;  %s764_s18 = smov 0  }
   0x6   :  { %s766_s19 = smov 0   ;;  %s768_s20 = smov 0  }
   0x7 LB: > { %s470_s21 = sadd.s32 4294967295, %s724_s20   ;;  %s471_s22 = sadd.s32 4294967294, %s724_s20   ;;  %s724_s20 = sphi %s768_s20, %s21_s20   ;;  %s720_s19 = sphi %s766_s19, %s1016_s19   ;;  %s716_s18 = sphi %s764_s18, %s1015_s18   ;;  %s712_s17 = sphi %s762_s17, %s1014_s17   ;;  %s708_s16 = sphi %s760_s16, %s1013_s16   ;;  %s704_s15 = sphi %s758_s15, %s1012_s15  }
   0x8   : > { %p55_p0 = scmp.ne.s32.totalorder %s708_s16, %s704_s15  ;;  %p792_p1 = scmp.eq.s32.totalorder %s470_s21, 0 }
   0x9   : > { %p796_p2 = scmp.eq.s32.totalorder %s470_s21, 1  ;;  %p155_p3 = scmp.eq.s32.totalorder %s471_s22, 1 }
   0xa   : > { %s997_s23 = scalar_select %p792_p1, 1, 0 }
   0xb   : > { %s998_s24 = scalar_select %p796_p2, 1, 0 }
   0xc   : > { %p802_p4 = por %p792_p1, %p55_p0  ;;  %p472_p5 = scmp.ge.s32.totalorder %s724_s20, 1 }
   0xd   : > { %p807_p6 = por %p155_p3, %p55_p0  ;;  %p162_p7 = scmp.lt.s32.totalorder %s724_s20, 3 }
   0xe   : > { %s999_s25 = scalar_select %p802_p4, 1, 0 }
   0xf   : > { %s1000_s26 = scalar_select %p807_p6, 1, 0 }
  0x10   : > { %p812_p8 = pnand %p472_p5, %p162_p7  ;;  %s726_s28 = smov [#allocation5]  }
  0x11   : > { %s174_s29 = sshll.u32 %s726_s28, 4  ;;  %s30_s5 = sadd.s32 1, %s720_s19  ;;  %s175_s29 = int_to_ptr.vmem [resolvable:$true] %s174_s29 }
  0x12   : > { %s1001_s27 = scalar_select %p812_p8, 1, 0 }
  0x13   : > { %p509_p9 = pneg %p812_p8  ;;  %s580_s8 = scalar_lea.hbm %s989_s1, 512 }
  0x14   : > { %p581_p12 = scmp.ne.s32.totalorder %s989_s1, %s580_s8  ;;  %p587_p5 = scmp.lt.u32.totalorder %s580_s8, %s989_s1 }
  0x15   : > { %p821_p11 = pnand %p509_p9, %p792_p1 }
  0x17   : > { %p582_p13 = pneg %p821_p11 }
  0x19   : > { %p583_p0 = pnand %p582_p13, %p581_p12 }
  0x1b   : > { %p584_p3 = pneg %p583_p0 }
  0x1d   : > { %p589_p7 = pnand %p587_p5, %p584_p3 }
  0x1f   : > { %592 = shalt.err (!%p589_p7)
}
  0x20   : > { %s593_s13 = scalar_lea.vmem %s175_s29, 512  ;;  %p601_p1 = scmp.lt.s32.totalorder %s175_s29, %s175_s29 }
  0x21   : > { %p594_p9 = scmp.ne.s32.totalorder %s175_s29, %s593_s13  ;;  %p602_p4 = scmp.lt.s32.totalorder %s593_s13, %s593_s13 }
  0x23   : > { %p596_p10 = pnand %p594_p9, %p582_p13  ;;  %p603_p8 = por %p602_p4, %p601_p1 }
  0x25   : > { %p597_p6 = pneg %p596_p10 }
  0x27   : > { %p604_p2 = pnand %p603_p8, %p597_p6 }
  0x29   : > { %607 = shalt.err (!%p604_p2)
}
  0x2a   : > { %s727_s14 = smov 128   ;;  %s728_s21 = smov 8  }
  0x2b   : > { %512 = dma.hbm_to_vmem [thread:$0]  (!%p821_p11), %s989_s1, 512, %s175_s29, [#allocation6], %s727_s14, %s727_s14, %s728_s21  }
  0x2c   : > { %p31_p1 = scmp.ge.s32.totalorder %s30_s5, 2  ;;  %s42_s6 = sadd.s32 1, %s712_s17 }
  0x2d   : > { %p49_p2 = scmp.ne.s32.totalorder %s712_s17, %s708_s16  ;;  %p50_p4 = scmp.eq.s32.totalorder %s724_s20, 0 }
  0x2e   : > { %s1018_s5 = smov (%p31_p1, %s30_s5), 0  ;;  %p1004_p8 = scmp.ne.s32.totalorder %s998_s24, 0 }
  0x2f   : > { %p848_p6 = por %p50_p4, %p49_p2  ;;  %s37_s30 = ssub.s32 %s720_s19, %s1018_s5 }
  0x30   : > { %p854_p10 = por %p1004_p8, %p49_p2  ;;  %p522_p12 = scmp.lt.s32.totalorder %s724_s20, 2 }
  0x31   : > { %p40_p11 = scmp.eq.s32.totalorder %s37_s30, 0  ;;  %s198_s29 = sand.u32 1, %s712_s17  }
  0x32   : > { %s476_s9 = sshll.u32 %s198_s29, 3  ;;  %s477_s11 = sshll.u32 %s720_s19, 7 }
  0x33   : > { %s863_s10 = scalar_select %p40_p11, %s712_s17, %s42_s6  }
  0x34   : > { %s869_s14 = scalar_lea.hbm %s988_s0, %s477_s11  ;;  %s202_s24 = scalar_lea.vmem [#allocation2], %s476_s9 }
  0x35   : > { %s210_s21 = sshll.u32 %s202_s24, 4  ;;  %p875_p13 = pnand %p522_p12, %p848_p6  ;;  %s871_s21 = int_to_ptr.vmem [resolvable:$true] %s210_s21 }
  0x36   : > { %s199_s28 = scalar_lea.sflag [#allocation3], %s198_s29  ;;  %s608_s6 = scalar_lea.hbm %s869_s14, 128 }
  0x37   : > { %p609_p0 = scmp.ne.s32.totalorder %s869_s14, %s608_s6  ;;  %p610_p3 = pneg %p875_p13 }
  0x38   : > { %s613_s11 = scalar_lea.hbm %s988_s0, 256  ;;  %p614_p9 = scmp.lt.u32.totalorder %s869_s14, %s988_s0 }
  0x39   : > { %p611_p5 = pnand %p610_p3, %p609_p0  ;;  %p615_p1 = scmp.lt.u32.totalorder %s613_s11, %s608_s6 }
  0x3a   : > { %p617_p4 = scmp.lt.u32.totalorder %s608_s6, %s869_s14 }
  0x3b   : > { %p612_p7 = pneg %p611_p5  ;;  %p616_p2 = por %p615_p1, %p614_p9 }
  0x3d   : > { %p618_p6 = por %p617_p4, %p616_p2 }
  0x3f   : > { %p619_p8 = pnand %p618_p6, %p612_p7 }
  0x41   : > { %622 = shalt.err (!%p619_p8)
}
  0x42   : > { %s623_s29 = scalar_lea.vmem %s871_s21, 128  ;;  %s729_s13 = smov [#allocation2]  }
  0x43   : > { %p624_p12 = scmp.ne.s32.totalorder %s871_s21, %s623_s29  ;;  %s628_s24 = sshll.u32 %s729_s13, 4  ;;  %s629_s24 = int_to_ptr.vmem [resolvable:$false] %s628_s24 }
  0x44   : > { %s630_s30 = scalar_lea.vmem %s629_s24, 256  ;;  %p631_p5 = scmp.lt.s32.totalorder %s871_s21, %s629_s24 }
  0x45   : > { %p626_p11 = pnand %p624_p12, %p610_p3  ;;  %p632_p9 = scmp.lt.s32.totalorder %s630_s30, %s623_s29 }
  0x47   : > { %p627_p0 = pneg %p626_p11  ;;  %p633_p1 = por %p632_p9, %p631_p5 }
  0x49   : > { %p634_p2 = pnand %p633_p1, %p627_p0 }
  0x4b   : > { %637 = shalt.err (!%p634_p2)
}
  0x4c   : > { %516 = dma.hbm_to_vmem [thread:$0]  (!%p875_p13), %s869_s14, 128, %s871_s21, %s199_s28  }
  0x4d   : > { %p1007_p7 = scmp.ne.s32.totalorder %s1001_s27, 0 }
  0x4e   : > { %s907_s6 = sand.u32 (!%p1007_p7), 1, %s708_s16   ;;  %p1008_p3 = scmp.ne.s32.totalorder (!%p1007_p7), %s999_s25, 0 }
  0x4f   : > { %219 = sbr.rel (%p1007_p7) target bundleno = 499 (0x1f3), region = 36  ;;  %s479_s9 = sshll.u32 (!%p1007_p7), %s907_s6, 3 }
  0x50   : > { %s222_s11 = scalar_lea.sflag (!%p1007_p7), [#allocation3], %s907_s6  ;;  %s225_s7 = scalar_lea.vmem (!%p1007_p7), [#allocation2], %s479_s9 }
  0x56   : > { %691 = dma.done.wait (%p1008_p3), %s222_s11, 128  }
  0x57   : > { %693 = vsyncadd (%p1008_p3), %s222_s11, 4294967168  ;;  %p1009_p13 = scmp.ne.s32.totalorder %s997_s23, 0 }
  0x59   : > { %695 = dma.done.wait (%p1009_p13), [#allocation6], 512  }
  0x5a   : > { %697 = vsyncadd (%p1009_p13), [#allocation6], 4294966784  ;;  %v730_v0 = vmov 0.0   ;;  %vm731_vm0 = vmmov 0   ;;  %v268_v1 = vld [vmem:[#allocation5] sm:$0xff]  ;;  %v269_v2 = vld [vmem:[#allocation5 + $0x8] sm:$0xff] }
  0x5b   : > { %493 = vmatprep.subr.bf16.mxu0 %v730_v0  ;;  %497 = vmatprep.mubr.msk.bf16.mxu0 %vm731_vm0, %v730_v0  ;;  %v270_v3 = vld [vmem:[#allocation5 + $0x10] sm:$0xff]  ;;  %v272_v4 = vpack.c.bf16 %v269_v2, %v268_v1  ;;  %v271_v5 = vld [vmem:[#allocation5 + $0x18] sm:$0xff]  ;;  %vm278_vm1 = vcmask 261120   ;;  %s487_s29 = sshll.u32 %s716_s18, 7  ;;  %s257_s13 = scalar_lea.vmem [#allocation7], %s479_s9 }
  0x5c   : > { %v273_v6 = vpack.c.bf16 %v271_v5, %v270_v3  ;;  %v266_v7 = vld [vmem:[%s225_s7] sm:$0xff]  ;;  %s365_s24 = sshll.u32 %s257_s13, 4  ;;  %s939_s7 = scalar_lea.hbm %s992_s4, %s487_s29  ;;  %s941_s24 = int_to_ptr.vmem [resolvable:$true] %s365_s24 }
  0x5d   : > { %494 = vmatpush3.bf16.msra.mxu0 %v272_v4  ;;  %v267_v8 = vpack.c.bf16 %v266_v7, %v266_v7  ;;  %v482_v9 = vld [vmem:[%s990_s2] ss:$0 sm:$0xff]  ;;  %v485_v26 = vld [vmem:[%s990_s2 + $0x2] ss:$0 sm:$0xff]  ;;  %v484_v29 = vld [vmem:[%s990_s2 + $0x1] ss:$0 sm:$0xff] }
  0x5e   : > { %495 = vmatprep.subr.bf16.mxu0 %v730_v0  ;;  %v341_v24 = vld [vmem:[%s991_s3] sm:$0xf]  ;;  %s351_s25 = scalar_lea.sflag [#allocation4], %s907_s6  ;;  %s638_s23 = scalar_lea.vmem %s941_s24, 128 }
  0x5f   : > { %v342_v25 = vunpack.c.l.bf16 %v341_v24  ;;  %p639_p4 = scmp.ne.s32.totalorder %s941_s24, %s638_s23  ;;  %s732_s18 = smov [#allocation7]  }
  0x60   : > { %s642_s9 = sshll.u32 %s732_s18, 4  ;;  %s643_s9 = int_to_ptr.vmem [resolvable:$false] %s642_s9 }
  0x61   : > { %496 = vmatpush3.bf16.msra.mxu0 %v273_v6  ;;  %v347_v31 = vadd.f32 %v485_v26, %v342_v25  ;;  %p640_p6 = pnand %p639_p4, %p854_p10  ;;  %s644_s27 = scalar_lea.vmem %s643_s9, 256 }
  0x62   : > { %p645_p12 = scmp.lt.s32.totalorder %s941_s24, %s643_s9  ;;  %p646_p11 = scmp.lt.s32.totalorder %s644_s27, %s638_s23 }
  0x63   : > { %p641_p8 = pneg %p640_p6 }
  0x64   : > { %498 = vmatmul.mubr.msk.bf16.vlgmr.msra.gmra.mrb[0].mxu0 %vm278_vm1, %v267_v8  ;;  %p647_p0 = por %p646_p11, %p645_p12 }
  0x66   : > { %p648_p5 = pnand %p647_p0, %p641_p8 }
 0x137   : > { %v316_v10 = vpop.f32.mrb[0].mxu0 }
 0x138   : > { %v317_v11 = vadd.f32 %v482_v9, %v316_v10  ;;  %v499_v12 = vpop.f32.mrb[1].mxu0 }
 0x139   : > { %v319_v13 = vpop.f32.mrb[2].mxu0 }
 0x13a   : > { %v500_v14 = vpop.f32.mrb[3].mxu0  ;;  %322 = vadd.xlane.f32.xlu0 %v317_v11  ;;  %v325_v15 = vmul.f32 %v317_v11, %v317_v11 }
 0x13e   : > { %326 = vadd.xlane.f32.xlu0 %v325_v15 }
 0x1c7   : > { %v323_v16 = vpop.xlane.xlu0 %322 }
 0x1c8   : > { %v324_v17 = vmul.f32 0.03125, %v323_v16 }
 0x1ca   : > { %v329_v19 = vmul.f32 %v324_v17, %v324_v17  ;;  %v332_v27 = vsub.f32 %v317_v11, %v324_v17 }
 0x1cb   : > { %v327_v18 = vpop.xlane.xlu0 %326 }
 0x1cc   : > { %v328_v20 = vmul.f32 0.03125, %v327_v18 }
 0x1ce   : > { %v330_v21 = vsub.f32 %v328_v20, %v329_v19 }
 0x1d0   : > { %v331_v22 = vmax.f32 %v330_v21, 0.0 }
 0x1d2   : > { %v333_v23 = vadd.f32 1e-05, %v331_v22 }
 0x1d4   : > { %578 = vrsqrt.f32 %v333_v23 }
 0x1de   : > { %v579_v28 = vpop.eup %578 }
 0x1df   : > { %v335_v30 = vmul.f32 %v579_v28, %v332_v27 }
 0x1e1   : > { %v340_v32 = vmul.f32 %v484_v29, %v335_v30 }
 0x1e3   : > { %v348_v33 = vadd.f32 %v347_v31, %v340_v32 }
 0x1e5   : > { %349 = vst [vmem:[%s257_s13] sm:$0xff] %v348_v33 }
 0x1e6   : > { %651 = shalt.err (!%p648_p5)
}
 0x1e7   : > { %s652_s6 = scalar_lea.hbm %s939_s7, 128  ;;  %s656_s22 = scalar_lea.hbm %s992_s4, 256 }
 0x1e8   : > { %p653_p9 = scmp.ne.s32.totalorder %s939_s7, %s652_s6  ;;  %p657_p7 = scmp.lt.u32.totalorder %s939_s7, %s992_s4 }
 0x1e9   : > { %p658_p3 = scmp.lt.u32.totalorder %s656_s22, %s652_s6  ;;  %p660_p4 = scmp.lt.u32.totalorder %s652_s6, %s939_s7 }
 0x1ea   : > { %p654_p1 = pnand %p653_p9, %p854_p10 }
 0x1eb   : > { %p659_p13 = por %p658_p3, %p657_p7 }
 0x1ec   : > { %p655_p2 = pneg %p654_p1 }
 0x1ed   : > { %p661_p6 = por %p660_p4, %p659_p13 }
 0x1ef   : > { %p662_p8 = pnand %p661_p6, %p655_p2 }
 0x1f1   : > { %665 = shalt.err (!%p662_p8)
}
 0x1f2   : > { %507 = dma.vmem_to_hbm [thread:$0]  (%p854_p10), %s941_s24, 128, %s939_s7, %s351_s25  }
 0x1f3 PF: > { %s377_s29 = sand.u32 1, %s704_s15   ;;  %p1010_p12 = scmp.ne.s32.totalorder %s1000_s26, 0 }
 0x1f4   : > { %p1011_p11 = scmp.ge.s32.totalorder %s724_s20, 2  ;;  %s378_s13 = scalar_lea.sflag [#allocation4], %s377_s29 }
 0x1f6   : > { %p518_p0 = pnand %p1011_p11, %p1010_p12 }
 0x1f8   : > { %699 = dma.done.wait (!%p518_p0), %s378_s13, 128  }
 0x1f9   : > { %701 = vsyncadd (!%p518_p0), %s378_s13, 4294967168  ;;  %s21_s20 = sadd.s32 1, %s724_s20   ;;  %s1012_s15 = smov %s708_s16 }
 0x1fa   : > { %p18_p5 = scmp.ge.s32.totalorder %s21_s20, 4   ;;  %s1013_s16 = smov %s712_s17 }
 0x1fb   : > { %s1014_s17 = smov %s863_s10  ;;  %s1015_s18 = smov %s720_s19 }
 0x1fc   : > { %s1016_s19 = smov %s1018_s5  ;;  %20 = sbr.rel (!%p18_p5) target bundleno = 7 (0x7), region = 88 }
 0x203   :  { %383 = vsyncpa [#allocation3], 1 }
 0x204   :  { %385 = vsyncpa [#allocation3 + $0x1], 1 }
 0x205   :  { %386 = vsyncpa [#allocation6], 1 }
 0x206   :  { %387 = vsyncpa [#allocation4], 1 }
 0x207   :  { %389 = vsyncpa [#allocation4 + $0x1], 1 }

</bundles_post_ra>
